<compile_context>
chip_gen: v5e
topology: v5e:2x2
jax: 0.10.0
libtpu: 0.0.40
codegen_flags: <defaults>
</compile_context>

<pallas_src>
import jax
import jax.numpy as jnp
from jax.experimental import pallas as pl
from jax.experimental.pallas import tpu as pltpu

# ---- problem sizes (small, consistent with the module) ----------------------
N, CIN, H, W = 2, 4, 16, 16          # x: (N, CIN, H, W)  (NCHW, PyTorch side)
EH, EW = 8, 8                        # edge: (N, 1, EH, EW)
RED = 32                             # reduction_dim (256 in the original; small here)
RATES = (6, 12, 18)                  # output_stride == 16
PAD = max(RATES)
NBR = 6                              # number of concatenated branches

# ---- packed-operand layout ---------------------------------------------------
M = N * H * W                        # 512 rows of the fused matmul
OFF_MEAN = 0                         # pooled-mean columns (img-pooling branch)
OFF_X = CIN                          # raw x columns (1x1 branch)
OFF_RATE = 2 * CIN                   # 27 shifted-tap column groups (3 dilated 3x3)
OFF_EDGE = OFF_RATE + 9 * CIN * len(RATES)   # 116: edge column
OFF_BIAS = OFF_EDGE + 1              # 117: constant-1 column (carries the folded-BN bias)
K_USED = OFF_BIAS + 1                # 118 used columns
KP = 128                             # lane-aligned K (zero padded)
NOUT = NBR * RED                     # 192 real output channels
NOUT_PAD = 256                       # multiple of 128 -> unmasked stores


# ---- Pallas kernel: one MXU matmul + ReLU ------------------------------------
def aspp_kernel(lhs_ref, w_ref, out_ref):
    # lhs_ref : (bm, KP)        packed im2col LHS, bf16 (incl. constant-1 bias column)
    # w_ref   : (KP, NOUT_PAD)  block-structured packed weights, bf16 (BN scale folded
    #                           into the columns, BN bias in row OFF_BIAS)
    # out_ref : (bm, NOUT_PAD)  bf16, lane-dense (unmasked stores)
    y = jnp.dot(lhs_ref[...], w_ref[...], preferred_element_type=jnp.float32)
    out_ref[...] = jnp.maximum(y, 0.0).astype(out_ref.dtype)


# ---- glue: bilinear resize with align_corners=True (matches F.interpolate) ---
def resize_bilinear_align_corners(img, out_h, out_w):
    # img: (N, H_in, W_in, C)  float32
    n, hi, wi, c = img.shape
    ys = jnp.zeros((out_h,), jnp.float32) if hi == 1 else jnp.linspace(0.0, hi - 1.0, out_h)
    xs = jnp.zeros((out_w,), jnp.float32) if wi == 1 else jnp.linspace(0.0, wi - 1.0, out_w)
    y0 = jnp.floor(ys).astype(jnp.int32)
    x0 = jnp.floor(xs).astype(jnp.int32)
    y1 = jnp.minimum(y0 + 1, hi - 1)
    x1 = jnp.minimum(x0 + 1, wi - 1)
    wy = (ys - y0.astype(jnp.float32))[None, :, None, None]
    wx = (xs - x0.astype(jnp.float32))[None, None, :, None]
    top = img[:, y0][:, :, x0] * (1.0 - wx) + img[:, y0][:, :, x1] * wx
    bot = img[:, y1][:, :, x0] * (1.0 - wx) + img[:, y1][:, :, x1] * wx
    return top * (1.0 - wy) + bot * wy


# ---- one-time weight packing (OUT of the per-call path) ----------------------
def pack_weights(params):
    """Block-structured packed weight with folded-BN scale in the columns and the
    folded-BN bias in row OFF_BIAS.  Padded rows/cols stay exactly zero so the 64
    padded output lanes stay 0 after ReLU before being sliced off."""
    sc, bi = params["scale"], params["bias"]              # (NBR, RED) each
    wp = jnp.zeros((KP, NOUT_PAD), jnp.float32)
    wp = wp.at[OFF_MEAN:OFF_MEAN + CIN, 0 * RED:1 * RED].set(params["w_img"] * sc[0][None, :])
    wp = wp.at[OFF_EDGE:OFF_EDGE + 1, 1 * RED:2 * RED].set(params["w_edge"] * sc[1][None, :])
    wp = wp.at[OFF_X:OFF_X + CIN, 2 * RED:3 * RED].set(params["w_1x1"] * sc[2][None, :])
    off = OFF_RATE
    for k in range(len(RATES)):
        wp = wp.at[off:off + 9 * CIN, (3 + k) * RED:(4 + k) * RED].set(
            params["w_r"][k].reshape(9 * CIN, RED) * sc[3 + k][None, :])
        off += 9 * CIN
    wp = wp.at[OFF_BIAS, :NOUT].set(bi.reshape(-1))        # bias via constant-1 LHS column
    return wp.astype(jnp.bfloat16)


# ---- per-call LHS packing (XLA, inside jit): im2col ---------------------------
def _pack_lhs(x_nchw, edge_nchw):
    x = jnp.transpose(x_nchw, (0, 2, 3, 1)).astype(jnp.float32)        # NHWC
    edge = jnp.transpose(edge_nchw, (0, 2, 3, 1)).astype(jnp.float32)  # NHWC
    n, h, w, cin = x.shape

    edge_rs = resize_bilinear_align_corners(edge, h, w)                # (N,H,W,1)
    pooled = jnp.broadcast_to(jnp.mean(x, axis=(1, 2), keepdims=True), (n, h, w, cin))
    x_pad = jnp.pad(x, ((0, 0), (PAD, PAD), (PAD, PAD), (0, 0)))       # (N,H+2P,W+2P,CIN)

    # im2col: mean cols | x cols | 3 rates x 9 taps x CIN | edge col | ones (bias) col.
    cols = [pooled, x]
    for r in RATES:
        for ky in range(3):
            for kx in range(3):
                dy, dx = (ky - 1) * r, (kx - 1) * r
                cols.append(x_pad[:, PAD + dy:PAD + dy + h, PAD + dx:PAD + dx + w, :])
    cols.append(edge_rs)
    cols.append(jnp.ones((n, h, w, 1), jnp.float32))                   # bias column
    lhs = jnp.concatenate(cols, axis=-1).reshape(n * h * w, K_USED)
    lhs = jnp.pad(lhs, ((0, 0), (0, KP - K_USED)))                     # (M, 128)
    return lhs.astype(jnp.bfloat16)                                    # halve LHS DMA bytes


# ---- forward wrapper ---------------------------------------------------------
def aspp_forward(x_nchw, edge_nchw, wp_bf16, *, grid_m=1):
    n = x_nchw.shape[0]
    lhs = _pack_lhs(x_nchw, edge_nchw)

    bm = M // grid_m   # 512 (single-TC chips) or 256 (v7x: one block per TensorCore)

    out = pl.pallas_call(
        aspp_kernel,
        out_shape=jax.ShapeDtypeStruct((M, NOUT_PAD), jnp.bfloat16),   # bf16 output DMA
        grid_spec=pltpu.PrefetchScalarGridSpec(
            num_scalar_prefetch=0,
            grid=(grid_m,),
            in_specs=[
                pl.BlockSpec((bm, KP), lambda i: (i, 0)),              # packed LHS
                pl.BlockSpec((KP, NOUT_PAD), lambda i: (0, 0)),        # packed weights (+bias row)
            ],
            out_specs=pl.BlockSpec((bm, NOUT_PAD), lambda i: (i, 0)),
        ),
        compiler_params=pltpu.CompilerParams(dimension_semantics=("parallel",)),
    )(lhs, wp_bf16)

    # (M, 256) bf16 -> drop pad cols -> (N, H, W, 192) f32 -> NCHW (N, 192, H, W)
    # to match the PyTorch module's concatenated output layout/dtype.
    out_nhwc = out[:, :NOUT].astype(jnp.float32).reshape(n, H, W, NOUT)
    return jnp.transpose(out_nhwc, (0, 3, 1, 2))


# ---- deterministic parameter init (folded eval-mode BN) ----------------------
def init_params(key):
    ks = jax.random.split(key, 10)
    w_img = 0.1 * jax.random.normal(ks[0], (CIN, RED), jnp.float32)
    w_edge = 0.1 * jax.random.normal(ks[1], (1, RED), jnp.float32)
    w_1x1 = 0.1 * jax.random.normal(ks[2], (CIN, RED), jnp.float32)
    w_r = [0.1 * jax.random.normal(ks[3 + i], (3, 3, CIN, RED), jnp.float32) for i in range(3)]
    gamma = 1.0 + 0.1 * jax.random.normal(ks[6], (NBR, RED), jnp.float32)
    beta = 0.1 * jax.random.normal(ks[7], (NBR, RED), jnp.float32)
    mean = 0.1 * jax.random.normal(ks[8], (NBR, RED), jnp.float32)
    var = 1.0 + 0.1 * jnp.abs(jax.random.normal(ks[9], (NBR, RED), jnp.float32))
    scale = gamma / jnp.sqrt(var + 1e-5)
    bias = beta - mean * scale
    return dict(w_img=w_img, w_edge=w_edge, w_1x1=w_1x1, w_r=w_r, scale=scale, bias=bias)


# ---- pure-JAX reference for validation ---------------------------------------
def ref_forward(x_nchw, edge_nchw, params):
    x = jnp.transpose(x_nchw, (0, 2, 3, 1)).astype(jnp.float32)
    edge = jnp.transpose(edge_nchw, (0, 2, 3, 1)).astype(jnp.float32)
    n, h, w, cin = x.shape
    relu = jax.nn.relu
    sc, bi = params["scale"], params["bias"]

    pooled = jnp.mean(x, axis=(1, 2), keepdims=True)
    img = relu(jnp.einsum("nhwc,cr->nhwr", pooled, params["w_img"]) * sc[0] + bi[0])
    img = jnp.broadcast_to(img, (n, h, w, RED))

    edge_rs = resize_bilinear_align_corners(edge, h, w)
    e = relu(jnp.einsum("nhwc,cr->nhwr", edge_rs, params["w_edge"]) * sc[1] + bi[1])
    y1 = relu(jnp.einsum("nhwc,cr->nhwr", x, params["w_1x1"]) * sc[2] + bi[2])

    outs = [img, e, y1]
    for k, r in enumerate(RATES):
        y = jax.lax.conv_general_dilated(
            x, params["w_r"][k], window_strides=(1, 1),
            padding=[(r, r), (r, r)], rhs_dilation=(r, r),
            dimension_numbers=("NHWC", "HWIO", "NHWC"))
        outs.append(relu(y * sc[3 + k] + bi[3 + k]))
    return jnp.transpose(jnp.concatenate(outs, axis=-1), (0, 3, 1, 2))


# ---- v7x TensorCore-split detection (best-effort, robust fallbacks) ----------
def _detect_grid_m():
    # Single grid step on single-TC chips (v5e/v6e); 2-way "parallel" row split on
    # chips with 2 TensorCores per device (v7x).  Checks a core-count attribute
    # first, then several device_kind spellings; defaults to 1 on any failure.
    try:
        d = jax.devices()[0]
        ncores = getattr(d, "num_cores", None) or getattr(d, "core_count", None)
        if ncores is not None and int(ncores) >= 2:
            return 2
        kind = str(getattr(d, "device_kind", "")).lower()
        if ("v7" in kind) or ("tpu7" in kind) or ("7x" in kind):
            return 2
    except Exception:
        pass
    return 1


if __name__ == "__main__":
    key = jax.random.PRNGKey(0)
    kx, ke, kp = jax.random.split(key, 3)
    x = jax.random.normal(kx, (N, CIN, H, W), jnp.float32)       # NCHW like PyTorch
    edge = jax.random.normal(ke, (N, 1, EH, EW), jnp.float32)    # low-res edge map
    params = init_params(kp)

    # Weights / folded-BN packed ONCE, outside the jitted per-call path.
    wp = jax.block_until_ready(pack_weights(params))

    grid_m = _detect_grid_m()

    fwd = jax.jit(aspp_forward, static_argnames=("grid_m",))
    out = jax.block_until_ready(fwd(x, edge, wp, grid_m=grid_m))
    assert out.shape == (N, NBR * RED, H, W), out.shape

    ref = ref_forward(x, edge, params)
    err = float(jnp.max(jnp.abs(out - ref)))
    # Operands and output are bf16 (f32 accumulate); the f32 reference uses XLA's
    # default-precision conv.  6e-2 abs leaves ~2x headroom over the worst-case
    # bf16 rounding of inputs + folded weights + output on O(1)-magnitude values.
    assert err < 6e-2, f"max abs err {err}"

    print("KERNEL_OK")
</pallas_src>

<mosaic_0001>
module attributes {stable_mosaic.version = 11 : i64} {
  func.func @aspp_kernel(%arg0: i32, %arg1: memref<512x128xbf16, #tpu.memory_space<vmem>>, %arg2: memref<128x256xbf16, #tpu.memory_space<vmem>>, %arg3: memref<512x256xbf16, #tpu.memory_space<vmem>>) attributes {dimension_semantics = [#tpu.dimension_semantics<parallel>], iteration_bounds = array<i64: 1>, scalar_prefetch = 0 : i64, scratch_operands = 0 : i64, tpu.core_type = #tpu.core_type<tc>, window_params = [{transform_indices = @transform_0, window_bounds = array<i64: 512, 128>}, {pipeline_mode = #tpu.pipeline_mode<synchronous>, transform_indices = @transform_1, window_bounds = array<i64: 128, 256>}, {transform_indices = @transform_2, window_bounds = array<i64: 512, 256>}]} {
    %c0 = arith.constant 0 : index
    %c0_0 = arith.constant 0 : index
    %0 = vector.load %arg1[%c0, %c0_0] : memref<512x128xbf16, #tpu.memory_space<vmem>>, vector<512x128xbf16>
    %c0_1 = arith.constant 0 : index
    %c0_2 = arith.constant 0 : index
    %1 = vector.load %arg2[%c0_1, %c0_2] : memref<128x256xbf16, #tpu.memory_space<vmem>>, vector<128x256xbf16>
    %cst = arith.constant dense<0.000000e+00> : vector<512x256xf32>
    %2 = tpu.matmul %0, %1, %cst {dimension_numbers = #tpu.dot_dimension_numbers<[1], [0], [0], [1], [0, 0, 1, 1], [], []>} : vector<512x128xbf16>, vector<128x256xbf16>, vector<512x256xf32> -> vector<512x256xf32>
    %cst_3 = arith.constant 0.000000e+00 : f32
    %3 = vector.broadcast %cst_3 : f32 to vector<512x256xf32>
    %4 = arith.maximumf %2, %3 : vector<512x256xf32>
    %5 = arith.truncf %4 : vector<512x256xf32> to vector<512x256xbf16>
    %c0_4 = arith.constant 0 : index
    %c0_5 = arith.constant 0 : index
    %6 = vector.load %arg3[%c0_4, %c0_5] : memref<512x256xbf16, #tpu.memory_space<vmem>>, vector<512x256xbf16>
    tpu.vector_store %arg3[%c0_4, %c0_5], %5 {strides = array<i32>} : memref<512x256xbf16, #tpu.memory_space<vmem>>, vector<512x256xbf16>,
    return
  }
  func.func @transform_0(%arg0: i32) -> (i32, i32) {
    %c0_i32 = arith.constant 0 : i32
    %c0_i32_0 = arith.constant 0 : i32
    return %arg0, %c0_i32 : i32, i32
  }
  func.func @transform_1(%arg0: i32) -> (i32, i32) {
    %c0_i32 = arith.constant 0 : i32
    %c0_i32_0 = arith.constant 0 : i32
    %c0_i32_1 = arith.constant 0 : i32
    return %c0_i32, %c0_i32_0 : i32, i32
  }
  func.func @transform_2(%arg0: i32) -> (i32, i32) {
    %c0_i32 = arith.constant 0 : i32
    %c0_i32_0 = arith.constant 0 : i32
    return %arg0, %c0_i32 : i32, i32
  }
}

</mosaic_0001>

<bundles_post_ra>
// kernel: aspp_forward.1
= control target key start
LH: loop header
LB: loop body
LE: loop exit
PB: predicated region body
PF: predicated region fallthrough
CT: control target
= control target key end

     0   :  { %s1616_s1 = inlined_call_operand.vmem [shape: bf16[128,256], index: 1, kind: input, shape index: {}]   ;;  %s1617_s0 = inlined_call_operand.vmem [shape: bf16[512,128], index: 0, kind: input, shape index: {}]   ;;  %s1618_s2 = inlined_call_operand.vmem [shape: bf16[512,256], index: 2, kind: output, shape index: {}]  }
   0x1   :  { %v1147_v0 = vld [vmem:[%s1616_s1 + $0x70] sm:$0xf]  ;;  %v1200_v1 = vld [vmem:[%s1616_s1 + $0x74] sm:$0xf0]  ;;  %v1199_v2 = vld [vmem:[%s1616_s1 + $0x74] sm:$0xf] }
   0x2   :  { %v1148_v3 = vor.u32 %v1200_v1, %v1147_v0  ;;  %v1149_v4 = vld [vmem:[%s1616_s1 + $0x78] sm:$0xf0]  ;;  %v1139_v5 = vld [vmem:[%s1616_s1 + $0x60] sm:$0xf]  ;;  %v1198_v6 = vld [vmem:[%s1616_s1 + $0x64] sm:$0xf0] }
   0x3   :  { %v1152_v7 = vor.u32 %v1199_v2, %v1149_v4  ;;  %v1197_v8 = vld [vmem:[%s1616_s1 + $0x64] sm:$0xf]  ;;  %v1141_v9 = vld [vmem:[%s1616_s1 + $0x68] sm:$0xf0]  ;;  %v1140_v10 = vor.u32 %v1198_v6, %v1139_v5  ;;  %v1131_v12 = vld [vmem:[%s1616_s1 + $0x50] sm:$0xf] }
   0x4   :  { %363 = vmatpush.bf16.msra.mxu0 %v1148_v3  ;;  %1201 = vmatpush.bf16.msra.mxu2 %v1148_v3  ;;  %v1144_v11 = vor.u32 %v1197_v8, %v1141_v9  ;;  %v1196_v13 = vld [vmem:[%s1616_s1 + $0x54] sm:$0xf0]  ;;  %v1195_v14 = vld [vmem:[%s1616_s1 + $0x54] sm:$0xf]  ;;  %v1133_v15 = vld [vmem:[%s1616_s1 + $0x58] sm:$0xf0] }
   0x5   :  { %532 = vmatpush.bf16.msra.mxu1 %v1152_v7  ;;  %1209 = vmatpush.bf16.msra.mxu3 %v1152_v7  ;;  %v1132_v16 = vor.u32 %v1196_v13, %v1131_v12  ;;  %v1136_v17 = vor.u32 %v1195_v14, %v1133_v15  ;;  %v1123_v18 = vld [vmem:[%s1616_s1 + $0x40] sm:$0xf]  ;;  %v1194_v19 = vld [vmem:[%s1616_s1 + $0x44] sm:$0xf0]  ;;  %v1193_v20 = vld [vmem:[%s1616_s1 + $0x44] sm:$0xf] }
   0x6   :  { %v1125_v21 = vld [vmem:[%s1616_s1 + $0x48] sm:$0xf0]  ;;  %v1124_v22 = vor.u32 %v1194_v19, %v1123_v18  ;;  %v1115_v24 = vld [vmem:[%s1616_s1 + $0x30] sm:$0xf]  ;;  %v1192_v25 = vld [vmem:[%s1616_s1 + $0x34] sm:$0xf0] }
   0x7   :  { %v1128_v23 = vor.u32 %v1193_v20, %v1125_v21  ;;  %v1191_v26 = vld [vmem:[%s1616_s1 + $0x34] sm:$0xf]  ;;  %v1117_v27 = vld [vmem:[%s1616_s1 + $0x38] sm:$0xf0]  ;;  %v1116_v28 = vor.u32 %v1192_v25, %v1115_v24  ;;  %v1107_v30 = vld [vmem:[%s1616_s1 + $0x20] sm:$0xf] }
   0x8   :  { %364 = vmatpush.bf16.msra.mxu0 %v1140_v10  ;;  %1202 = vmatpush.bf16.msra.mxu2 %v1140_v10  ;;  %v1120_v29 = vor.u32 %v1191_v26, %v1117_v27  ;;  %v1190_v31 = vld [vmem:[%s1616_s1 + $0x24] sm:$0xf0]  ;;  %v1189_v32 = vld [vmem:[%s1616_s1 + $0x24] sm:$0xf]  ;;  %v1109_v33 = vld [vmem:[%s1616_s1 + $0x28] sm:$0xf0] }
   0x9   :  { %533 = vmatpush.bf16.msra.mxu1 %v1144_v11  ;;  %1210 = vmatpush.bf16.msra.mxu3 %v1144_v11  ;;  %v1108_v34 = vor.u32 %v1190_v31, %v1107_v30  ;;  %v1112_v35 = vor.u32 %v1189_v32, %v1109_v33  ;;  %v1099_v36 = vld [vmem:[%s1616_s1 + $0x10] sm:$0xf]  ;;  %v1188_v37 = vld [vmem:[%s1616_s1 + $0x14] sm:$0xf0]  ;;  %v1187_v38 = vld [vmem:[%s1616_s1 + $0x14] sm:$0xf] }
   0xa   :  { %v1101_v39 = vld [vmem:[%s1616_s1 + $0x18] sm:$0xf0]  ;;  %v1100_v40 = vor.u32 %v1188_v37, %v1099_v36  ;;  %v1091_v42 = vld [vmem:[%s1616_s1] sm:$0xf]  ;;  %v1186_v43 = vld [vmem:[%s1616_s1 + $0x4] sm:$0xf0] }
   0xb   :  { %v1104_v41 = vor.u32 %v1187_v38, %v1101_v39  ;;  %v1185_v44 = vld [vmem:[%s1616_s1 + $0x4] sm:$0xf]  ;;  %v1093_v45 = vld [vmem:[%s1616_s1 + $0x8] sm:$0xf0]  ;;  %v1092_v46 = vor.u32 %v1186_v43, %v1091_v42  ;;  %v1155_v52 = vld [vmem:[%s1617_s0 + $0x10] sm:$0xff] }
   0xc   :  { %365 = vmatpush.bf16.msra.mxu0 %v1132_v16  ;;  %1203 = vmatpush.bf16.msra.mxu2 %v1132_v16  ;;  %v1096_v47 = vor.u32 %v1185_v44, %v1093_v45  ;;  %v1153_v48 = vld [vmem:[%s1617_s0] sm:$0xff]  ;;  %v1154_v50 = vld [vmem:[%s1617_s0 + $0x8] sm:$0xff]  ;;  %v1171_v53 = vld [vmem:[%s1617_s0 + $0x90] sm:$0xff] }
   0xd   :  { %534 = vmatpush.bf16.msra.mxu1 %v1136_v17  ;;  %1211 = vmatpush.bf16.msra.mxu3 %v1136_v17  ;;  %v1169_v49 = vld [vmem:[%s1617_s0 + $0x80] sm:$0xff]  ;;  %v1170_v51 = vld [vmem:[%s1617_s0 + $0x88] sm:$0xff]  ;;  %v1156_v54 = vld [vmem:[%s1617_s0 + $0x18] sm:$0xff] }
   0xe   :  { %v1172_v55 = vld [vmem:[%s1617_s0 + $0x98] sm:$0xff]  ;;  %v1157_v56 = vld [vmem:[%s1617_s0 + $0x20] sm:$0xff]  ;;  %v1158_v58 = vld [vmem:[%s1617_s0 + $0x28] sm:$0xff] }
   0xf   :  { %v1173_v57 = vld [vmem:[%s1617_s0 + $0xa0] sm:$0xff]  ;;  %v1174_v59 = vld [vmem:[%s1617_s0 + $0xa8] sm:$0xff]  ;;  %v1159_v60 = vld [vmem:[%s1617_s0 + $0x30] sm:$0xff] }
  0x10   :  { %366 = vmatpush.bf16.msra.mxu0 %v1124_v22  ;;  %1204 = vmatpush.bf16.msra.mxu2 %v1124_v22  ;;  %v1175_v61 = vld [vmem:[%s1617_s0 + $0xb0] sm:$0xff]  ;;  %v1160_v62 = vld [vmem:[%s1617_s0 + $0x38] sm:$0xff]  ;;  %v1161_v0 = vld [vmem:[%s1617_s0 + $0x40] sm:$0xff] }
  0x11   :  { %535 = vmatpush.bf16.msra.mxu1 %v1128_v23  ;;  %1212 = vmatpush.bf16.msra.mxu3 %v1128_v23  ;;  %v1176_v63 = vld [vmem:[%s1617_s0 + $0xb8] sm:$0xff]  ;;  %v1177_v1 = vld [vmem:[%s1617_s0 + $0xc0] sm:$0xff]  ;;  %v1162_v20 = vld [vmem:[%s1617_s0 + $0x48] sm:$0xff] }
  0x12   :  { %v1178_v21 = vld [vmem:[%s1617_s0 + $0xc8] sm:$0xff]  ;;  %v1163_v42 = vld [vmem:[%s1617_s0 + $0x50] sm:$0xff] }
  0x13   :  { %v1179_v43 = vld [vmem:[%s1617_s0 + $0xd0] sm:$0xff] }
  0x14   :  { %367 = vmatpush.bf16.msra.mxu0 %v1116_v28  ;;  %1205 = vmatpush.bf16.msra.mxu2 %v1116_v28 }
  0x15   :  { %536 = vmatpush.bf16.msra.mxu1 %v1120_v29  ;;  %1213 = vmatpush.bf16.msra.mxu3 %v1120_v29 }
  0x18   :  { %368 = vmatpush.bf16.msra.mxu0 %v1108_v34  ;;  %1206 = vmatpush.bf16.msra.mxu2 %v1108_v34 }
  0x19   :  { %537 = vmatpush.bf16.msra.mxu1 %v1112_v35  ;;  %1214 = vmatpush.bf16.msra.mxu3 %v1112_v35 }
  0x1c   :  { %369 = vmatpush.bf16.msra.mxu0 %v1100_v40  ;;  %1207 = vmatpush.bf16.msra.mxu2 %v1100_v40 }
  0x1d   :  { %538 = vmatpush.bf16.msra.mxu1 %v1104_v41  ;;  %1215 = vmatpush.bf16.msra.mxu3 %v1104_v41 }
  0x20   :  { %370 = vmatpush.bf16.msra.mxu0 %v1092_v46  ;;  %1208 = vmatpush.bf16.msra.mxu2 %v1092_v46 }
  0x21   :  { %539 = vmatpush.bf16.msra.mxu1 %v1096_v47  ;;  %1216 = vmatpush.bf16.msra.mxu3 %v1096_v47 }
  0x23   :  { %371 = vmatmul.bf16.vlgmr.msra.gmra.mxu0 %v1153_v48  ;;  %451 = vmatmul.bf16.vlgmr.msra.gmra.mxu2 %v1169_v49 }
  0x24   :  { %540 = vmatmul.bf16.vlgmr.msra.gmra.mxu1 %v1153_v48  ;;  %620 = vmatmul.bf16.vlgmr.msra.gmra.mxu3 %v1169_v49 }
  0x33   :  { %376 = vmatmul.bf16.gmra.mxu0 %v1154_v50  ;;  %456 = vmatmul.bf16.gmra.mxu2 %v1170_v51 }
  0x34   :  { %545 = vmatmul.bf16.gmra.mxu1 %v1154_v50  ;;  %625 = vmatmul.bf16.gmra.mxu3 %v1170_v51 }
  0x43   :  { %381 = vmatmul.bf16.gmra.mxu0 %v1155_v52  ;;  %461 = vmatmul.bf16.gmra.mxu2 %v1171_v53 }
  0x44   :  { %550 = vmatmul.bf16.gmra.mxu1 %v1155_v52  ;;  %630 = vmatmul.bf16.gmra.mxu3 %v1171_v53 }
  0x53   :  { %386 = vmatmul.bf16.gmra.mxu0 %v1156_v54  ;;  %466 = vmatmul.bf16.gmra.mxu2 %v1172_v55 }
  0x54   :  { %555 = vmatmul.bf16.gmra.mxu1 %v1156_v54  ;;  %635 = vmatmul.bf16.gmra.mxu3 %v1172_v55 }
  0x63   :  { %391 = vmatmul.bf16.gmra.mxu0 %v1157_v56  ;;  %471 = vmatmul.bf16.gmra.mxu2 %v1173_v57 }
  0x64   :  { %560 = vmatmul.bf16.gmra.mxu1 %v1157_v56  ;;  %640 = vmatmul.bf16.gmra.mxu3 %v1173_v57 }
  0x73   :  { %396 = vmatmul.bf16.gmra.mxu0 %v1158_v58  ;;  %476 = vmatmul.bf16.gmra.mxu2 %v1174_v59 }
  0x74   :  { %565 = vmatmul.bf16.gmra.mxu1 %v1158_v58  ;;  %645 = vmatmul.bf16.gmra.mxu3 %v1174_v59 }
  0x83   :  { %401 = vmatmul.bf16.gmra.mxu0 %v1159_v60  ;;  %481 = vmatmul.bf16.gmra.mxu2 %v1175_v61 }
  0x84   :  { %570 = vmatmul.bf16.gmra.mxu1 %v1159_v60  ;;  %650 = vmatmul.bf16.gmra.mxu3 %v1175_v61 }
  0x93   :  { %406 = vmatmul.bf16.gmra.mxu0 %v1160_v62  ;;  %486 = vmatmul.bf16.gmra.mxu2 %v1176_v63 }
  0x94   :  { %575 = vmatmul.bf16.gmra.mxu1 %v1160_v62  ;;  %655 = vmatmul.bf16.gmra.mxu3 %v1176_v63 }
  0xa0   :  { %v372_v2 = vpop.f32.mrf.mxu0 }
  0xa1   :  { %v701_v3 = vmax.f32 %v372_v2, 0.0  ;;  %v541_v4 = vpop.f32.mrf.mxu1 }
  0xa2   :  { %v702_v5 = vmax.f32 %v541_v4, 0.0 }
  0xa3   :  { %411 = vmatmul.bf16.gmra.mxu0 %v1161_v0  ;;  %491 = vmatmul.bf16.gmra.mxu2 %v1177_v1 }
  0xa4   :  { %v829_v6 = vpack.c.bf16 %v702_v5, %v701_v3  ;;  %580 = vmatmul.bf16.gmra.mxu1 %v1161_v0  ;;  %660 = vmatmul.bf16.gmra.mxu3 %v1177_v1  ;;  %v1164_v0 = vld [vmem:[%s1617_s0 + $0x58] sm:$0xff] }
  0xa5   :  { %v1180_v1 = vld [vmem:[%s1617_s0 + $0xd8] sm:$0xff] }
  0xa6   :  { %893 = vst [vmem:[%s1618_s2] sm:$0xff] %v829_v6  ;;  %v452_v7 = vpop.f32.mrf.mxu2 }
  0xa7   :  { %v765_v8 = vmax.f32 %v452_v7, 0.0  ;;  %v621_v9 = vpop.f32.mrf.mxu3 }
  0xa8   :  { %v766_v10 = vmax.f32 %v621_v9, 0.0  ;;  %v374_v11 = vpop.f32.mrf.mxu0 }
  0xa9   :  { %v703_v12 = vmax.f32 %v374_v11, 0.0  ;;  %v543_v13 = vpop.f32.mrf.mxu1 }
  0xaa   :  { %v861_v14 = vpack.c.bf16 %v766_v10, %v765_v8  ;;  %v704_v15 = vmax.f32 %v543_v13, 0.0 }
  0xac   :  { %925 = vst [vmem:[%s1618_s2 + $0x100] sm:$0xff] %v861_v14  ;;  %v830_v16 = vpack.c.bf16 %v704_v15, %v703_v12 }
  0xae   :  { %894 = vst [vmem:[%s1618_s2 + $0x8] sm:$0xff] %v830_v16  ;;  %v454_v17 = vpop.f32.mrf.mxu2 }
  0xaf   :  { %v767_v18 = vmax.f32 %v454_v17, 0.0  ;;  %v623_v19 = vpop.f32.mrf.mxu3 }
  0xb0   :  { %v768_v22 = vmax.f32 %v623_v19, 0.0  ;;  %v377_v23 = vpop.f32.mrf.mxu0 }
  0xb1   :  { %v705_v24 = vmax.f32 %v377_v23, 0.0  ;;  %v546_v25 = vpop.f32.mrf.mxu1  ;;  %v1181_v23 = vld [vmem:[%s1617_s0 + $0xe0] sm:$0xff] }
  0xb2   :  { %v862_v26 = vpack.c.bf16 %v768_v22, %v767_v18  ;;  %v706_v27 = vmax.f32 %v546_v25, 0.0  ;;  %v1165_v22 = vld [vmem:[%s1617_s0 + $0x60] sm:$0xff] }
  0xb3   :  { %416 = vmatmul.bf16.gmra.mxu0 %v1162_v20  ;;  %496 = vmatmul.bf16.gmra.mxu2 %v1178_v21 }
  0xb4   :  { %926 = vst [vmem:[%s1618_s2 + $0x108] sm:$0xff] %v862_v26  ;;  %v831_v28 = vpack.c.bf16 %v706_v27, %v705_v24  ;;  %585 = vmatmul.bf16.gmra.mxu1 %v1162_v20  ;;  %665 = vmatmul.bf16.gmra.mxu3 %v1178_v21 }
  0xb6   :  { %895 = vst [vmem:[%s1618_s2 + $0x10] sm:$0xff] %v831_v28  ;;  %v457_v29 = vpop.f32.mrf.mxu2 }
  0xb7   :  { %v769_v30 = vmax.f32 %v457_v29, 0.0  ;;  %v626_v31 = vpop.f32.mrf.mxu3 }
  0xb8   :  { %v770_v32 = vmax.f32 %v626_v31, 0.0  ;;  %v379_v33 = vpop.f32.mrf.mxu0 }
  0xb9   :  { %v707_v34 = vmax.f32 %v379_v33, 0.0  ;;  %v548_v35 = vpop.f32.mrf.mxu1 }
  0xba   :  { %v863_v36 = vpack.c.bf16 %v770_v32, %v769_v30  ;;  %v708_v37 = vmax.f32 %v548_v35, 0.0 }
  0xbc   :  { %927 = vst [vmem:[%s1618_s2 + $0x110] sm:$0xff] %v863_v36  ;;  %v832_v38 = vpack.c.bf16 %v708_v37, %v707_v34 }
  0xbe   :  { %896 = vst [vmem:[%s1618_s2 + $0x18] sm:$0xff] %v832_v38  ;;  %v459_v39 = vpop.f32.mrf.mxu2 }
  0xbf   :  { %v771_v40 = vmax.f32 %v459_v39, 0.0  ;;  %v628_v41 = vpop.f32.mrf.mxu3 }
  0xc0   :  { %v772_v44 = vmax.f32 %v628_v41, 0.0  ;;  %v382_v45 = vpop.f32.mrf.mxu0 }
  0xc1   :  { %v709_v46 = vmax.f32 %v382_v45, 0.0  ;;  %v551_v47 = vpop.f32.mrf.mxu1  ;;  %v1182_v45 = vld [vmem:[%s1617_s0 + $0xe8] sm:$0xff] }
  0xc2   :  { %v864_v48 = vpack.c.bf16 %v772_v44, %v771_v40  ;;  %v710_v49 = vmax.f32 %v551_v47, 0.0  ;;  %v1166_v44 = vld [vmem:[%s1617_s0 + $0x68] sm:$0xff] }
  0xc3   :  { %421 = vmatmul.bf16.gmra.mxu0 %v1163_v42  ;;  %501 = vmatmul.bf16.gmra.mxu2 %v1179_v43 }
  0xc4   :  { %928 = vst [vmem:[%s1618_s2 + $0x118] sm:$0xff] %v864_v48  ;;  %v833_v50 = vpack.c.bf16 %v710_v49, %v709_v46  ;;  %590 = vmatmul.bf16.gmra.mxu1 %v1163_v42  ;;  %670 = vmatmul.bf16.gmra.mxu3 %v1179_v43 }
  0xc6   :  { %897 = vst [vmem:[%s1618_s2 + $0x20] sm:$0xff] %v833_v50  ;;  %v462_v51 = vpop.f32.mrf.mxu2 }
  0xc7   :  { %v773_v52 = vmax.f32 %v462_v51, 0.0  ;;  %v631_v53 = vpop.f32.mrf.mxu3 }
  0xc8   :  { %v774_v54 = vmax.f32 %v631_v53, 0.0  ;;  %v384_v55 = vpop.f32.mrf.mxu0 }
  0xc9   :  { %v711_v56 = vmax.f32 %v384_v55, 0.0  ;;  %v553_v57 = vpop.f32.mrf.mxu1 }
  0xca   :  { %v865_v58 = vpack.c.bf16 %v774_v54, %v773_v52  ;;  %v712_v59 = vmax.f32 %v553_v57, 0.0 }
  0xcc   :  { %929 = vst [vmem:[%s1618_s2 + $0x120] sm:$0xff] %v865_v58  ;;  %v834_v60 = vpack.c.bf16 %v712_v59, %v711_v56 }
  0xce   :  { %898 = vst [vmem:[%s1618_s2 + $0x28] sm:$0xff] %v834_v60  ;;  %v464_v61 = vpop.f32.mrf.mxu2 }
  0xcf   :  { %v775_v62 = vmax.f32 %v464_v61, 0.0  ;;  %v633_v63 = vpop.f32.mrf.mxu3 }
  0xd0   :  { %v776_v2 = vmax.f32 %v633_v63, 0.0  ;;  %v387_v3 = vpop.f32.mrf.mxu0 }
  0xd1   :  { %v713_v4 = vmax.f32 %v387_v3, 0.0  ;;  %v556_v5 = vpop.f32.mrf.mxu1  ;;  %v1183_v3 = vld [vmem:[%s1617_s0 + $0xf0] sm:$0xff] }
  0xd2   :  { %v866_v6 = vpack.c.bf16 %v776_v2, %v775_v62  ;;  %v714_v7 = vmax.f32 %v556_v5, 0.0  ;;  %v1167_v2 = vld [vmem:[%s1617_s0 + $0x70] sm:$0xff] }
  0xd3   :  { %426 = vmatmul.bf16.gmra.mxu0 %v1164_v0  ;;  %506 = vmatmul.bf16.gmra.mxu2 %v1180_v1 }
  0xd4   :  { %930 = vst [vmem:[%s1618_s2 + $0x128] sm:$0xff] %v866_v6  ;;  %v835_v8 = vpack.c.bf16 %v714_v7, %v713_v4  ;;  %595 = vmatmul.bf16.gmra.mxu1 %v1164_v0  ;;  %675 = vmatmul.bf16.gmra.mxu3 %v1180_v1 }
  0xd6   :  { %899 = vst [vmem:[%s1618_s2 + $0x30] sm:$0xff] %v835_v8  ;;  %v467_v9 = vpop.f32.mrf.mxu2 }
  0xd7   :  { %v777_v10 = vmax.f32 %v467_v9, 0.0  ;;  %v636_v11 = vpop.f32.mrf.mxu3 }
  0xd8   :  { %v778_v12 = vmax.f32 %v636_v11, 0.0  ;;  %v389_v13 = vpop.f32.mrf.mxu0 }
  0xd9   :  { %v715_v14 = vmax.f32 %v389_v13, 0.0  ;;  %v558_v15 = vpop.f32.mrf.mxu1 }
  0xda   :  { %v867_v16 = vpack.c.bf16 %v778_v12, %v777_v10  ;;  %v716_v17 = vmax.f32 %v558_v15, 0.0 }
  0xdc   :  { %931 = vst [vmem:[%s1618_s2 + $0x130] sm:$0xff] %v867_v16  ;;  %v836_v18 = vpack.c.bf16 %v716_v17, %v715_v14 }
  0xde   :  { %900 = vst [vmem:[%s1618_s2 + $0x38] sm:$0xff] %v836_v18  ;;  %v469_v19 = vpop.f32.mrf.mxu2 }
  0xdf   :  { %v779_v20 = vmax.f32 %v469_v19, 0.0  ;;  %v638_v21 = vpop.f32.mrf.mxu3 }
  0xe0   :  { %v780_v24 = vmax.f32 %v638_v21, 0.0  ;;  %v392_v25 = vpop.f32.mrf.mxu0 }
  0xe1   :  { %v717_v26 = vmax.f32 %v392_v25, 0.0  ;;  %v561_v27 = vpop.f32.mrf.mxu1  ;;  %v1184_v25 = vld [vmem:[%s1617_s0 + $0xf8] sm:$0xff] }
  0xe2   :  { %v868_v28 = vpack.c.bf16 %v780_v24, %v779_v20  ;;  %v718_v29 = vmax.f32 %v561_v27, 0.0  ;;  %v1168_v24 = vld [vmem:[%s1617_s0 + $0x78] sm:$0xff] }
  0xe3   :  { %431 = vmatmul.bf16.gmra.mxu0 %v1165_v22  ;;  %511 = vmatmul.bf16.gmra.mxu2 %v1181_v23 }
  0xe4   :  { %932 = vst [vmem:[%s1618_s2 + $0x138] sm:$0xff] %v868_v28  ;;  %v837_v30 = vpack.c.bf16 %v718_v29, %v717_v26  ;;  %600 = vmatmul.bf16.gmra.mxu1 %v1165_v22  ;;  %680 = vmatmul.bf16.gmra.mxu3 %v1181_v23 }
  0xe6   :  { %901 = vst [vmem:[%s1618_s2 + $0x40] sm:$0xff] %v837_v30  ;;  %v472_v31 = vpop.f32.mrf.mxu2 }
  0xe7   :  { %v781_v32 = vmax.f32 %v472_v31, 0.0  ;;  %v641_v33 = vpop.f32.mrf.mxu3 }
  0xe8   :  { %v782_v34 = vmax.f32 %v641_v33, 0.0  ;;  %v394_v35 = vpop.f32.mrf.mxu0 }
  0xe9   :  { %v719_v36 = vmax.f32 %v394_v35, 0.0  ;;  %v563_v37 = vpop.f32.mrf.mxu1 }
  0xea   :  { %v869_v38 = vpack.c.bf16 %v782_v34, %v781_v32  ;;  %v720_v39 = vmax.f32 %v563_v37, 0.0 }
  0xec   :  { %933 = vst [vmem:[%s1618_s2 + $0x140] sm:$0xff] %v869_v38  ;;  %v838_v40 = vpack.c.bf16 %v720_v39, %v719_v36 }
  0xee   :  { %902 = vst [vmem:[%s1618_s2 + $0x48] sm:$0xff] %v838_v40  ;;  %v474_v41 = vpop.f32.mrf.mxu2 }
  0xef   :  { %v783_v42 = vmax.f32 %v474_v41, 0.0  ;;  %v643_v43 = vpop.f32.mrf.mxu3 }
  0xf0   :  { %v784_v46 = vmax.f32 %v643_v43, 0.0  ;;  %v397_v47 = vpop.f32.mrf.mxu0 }
  0xf1   :  { %v721_v48 = vmax.f32 %v397_v47, 0.0  ;;  %v566_v49 = vpop.f32.mrf.mxu1 }
  0xf2   :  { %v870_v50 = vpack.c.bf16 %v784_v46, %v783_v42  ;;  %v722_v51 = vmax.f32 %v566_v49, 0.0 }
  0xf3   :  { %436 = vmatmul.bf16.gmra.mxu0 %v1166_v44  ;;  %516 = vmatmul.bf16.gmra.mxu2 %v1182_v45 }
  0xf4   :  { %934 = vst [vmem:[%s1618_s2 + $0x148] sm:$0xff] %v870_v50  ;;  %v839_v52 = vpack.c.bf16 %v722_v51, %v721_v48  ;;  %605 = vmatmul.bf16.gmra.mxu1 %v1166_v44  ;;  %685 = vmatmul.bf16.gmra.mxu3 %v1182_v45 }
  0xf6   :  { %903 = vst [vmem:[%s1618_s2 + $0x50] sm:$0xff] %v839_v52  ;;  %v477_v53 = vpop.f32.mrf.mxu2 }
  0xf7   :  { %v785_v54 = vmax.f32 %v477_v53, 0.0  ;;  %v646_v55 = vpop.f32.mrf.mxu3 }
  0xf8   :  { %v786_v56 = vmax.f32 %v646_v55, 0.0  ;;  %v399_v57 = vpop.f32.mrf.mxu0 }
  0xf9   :  { %v723_v58 = vmax.f32 %v399_v57, 0.0  ;;  %v568_v59 = vpop.f32.mrf.mxu1 }
  0xfa   :  { %v871_v60 = vpack.c.bf16 %v786_v56, %v785_v54  ;;  %v724_v61 = vmax.f32 %v568_v59, 0.0 }
  0xfc   :  { %935 = vst [vmem:[%s1618_s2 + $0x150] sm:$0xff] %v871_v60  ;;  %v840_v62 = vpack.c.bf16 %v724_v61, %v723_v58 }
  0xfe   :  { %904 = vst [vmem:[%s1618_s2 + $0x58] sm:$0xff] %v840_v62  ;;  %v479_v63 = vpop.f32.mrf.mxu2 }
  0xff   :  { %v787_v0 = vmax.f32 %v479_v63, 0.0  ;;  %v648_v1 = vpop.f32.mrf.mxu3 }
 0x100   :  { %v788_v4 = vmax.f32 %v648_v1, 0.0  ;;  %v402_v5 = vpop.f32.mrf.mxu0 }
 0x101   :  { %v725_v6 = vmax.f32 %v402_v5, 0.0  ;;  %v571_v7 = vpop.f32.mrf.mxu1 }
 0x102   :  { %v872_v8 = vpack.c.bf16 %v788_v4, %v787_v0  ;;  %v726_v9 = vmax.f32 %v571_v7, 0.0 }
 0x103   :  { %441 = vmatmul.bf16.gmra.mxu0 %v1167_v2  ;;  %521 = vmatmul.bf16.gmra.mxu2 %v1183_v3 }
 0x104   :  { %936 = vst [vmem:[%s1618_s2 + $0x158] sm:$0xff] %v872_v8  ;;  %v841_v10 = vpack.c.bf16 %v726_v9, %v725_v6  ;;  %610 = vmatmul.bf16.gmra.mxu1 %v1167_v2  ;;  %690 = vmatmul.bf16.gmra.mxu3 %v1183_v3 }
 0x106   :  { %905 = vst [vmem:[%s1618_s2 + $0x60] sm:$0xff] %v841_v10  ;;  %v482_v11 = vpop.f32.mrf.mxu2 }
 0x107   :  { %v789_v12 = vmax.f32 %v482_v11, 0.0  ;;  %v651_v13 = vpop.f32.mrf.mxu3 }
 0x108   :  { %v790_v14 = vmax.f32 %v651_v13, 0.0  ;;  %v404_v15 = vpop.f32.mrf.mxu0 }
 0x109   :  { %v727_v16 = vmax.f32 %v404_v15, 0.0  ;;  %v573_v17 = vpop.f32.mrf.mxu1 }
 0x10a   :  { %v873_v18 = vpack.c.bf16 %v790_v14, %v789_v12  ;;  %v728_v19 = vmax.f32 %v573_v17, 0.0 }
 0x10c   :  { %937 = vst [vmem:[%s1618_s2 + $0x160] sm:$0xff] %v873_v18  ;;  %v842_v20 = vpack.c.bf16 %v728_v19, %v727_v16 }
 0x10e   :  { %906 = vst [vmem:[%s1618_s2 + $0x68] sm:$0xff] %v842_v20  ;;  %v484_v21 = vpop.f32.mrf.mxu2 }
 0x10f   :  { %v791_v22 = vmax.f32 %v484_v21, 0.0  ;;  %v653_v23 = vpop.f32.mrf.mxu3 }
 0x110   :  { %v792_v26 = vmax.f32 %v653_v23, 0.0  ;;  %v407_v27 = vpop.f32.mrf.mxu0 }
 0x111   :  { %v729_v28 = vmax.f32 %v407_v27, 0.0  ;;  %v576_v29 = vpop.f32.mrf.mxu1 }
 0x112   :  { %v874_v30 = vpack.c.bf16 %v792_v26, %v791_v22  ;;  %v730_v31 = vmax.f32 %v576_v29, 0.0 }
 0x113   :  { %446 = vmatmul.bf16.gmra.mxu0 %v1168_v24  ;;  %526 = vmatmul.bf16.gmra.mxu2 %v1184_v25 }
 0x114   :  { %938 = vst [vmem:[%s1618_s2 + $0x168] sm:$0xff] %v874_v30  ;;  %v843_v32 = vpack.c.bf16 %v730_v31, %v729_v28  ;;  %615 = vmatmul.bf16.gmra.mxu1 %v1168_v24  ;;  %695 = vmatmul.bf16.gmra.mxu3 %v1184_v25 }
 0x116   :  { %907 = vst [vmem:[%s1618_s2 + $0x70] sm:$0xff] %v843_v32  ;;  %v487_v33 = vpop.f32.mrf.mxu2 }
 0x117   :  { %v793_v34 = vmax.f32 %v487_v33, 0.0  ;;  %v656_v35 = vpop.f32.mrf.mxu3 }
 0x118   :  { %v794_v36 = vmax.f32 %v656_v35, 0.0  ;;  %v409_v37 = vpop.f32.mrf.mxu0 }
 0x119   :  { %v731_v38 = vmax.f32 %v409_v37, 0.0  ;;  %v578_v39 = vpop.f32.mrf.mxu1 }
 0x11a   :  { %v875_v40 = vpack.c.bf16 %v794_v36, %v793_v34  ;;  %v732_v41 = vmax.f32 %v578_v39, 0.0 }
 0x11c   :  { %939 = vst [vmem:[%s1618_s2 + $0x170] sm:$0xff] %v875_v40  ;;  %v844_v42 = vpack.c.bf16 %v732_v41, %v731_v38 }
 0x11e   :  { %908 = vst [vmem:[%s1618_s2 + $0x78] sm:$0xff] %v844_v42  ;;  %v489_v43 = vpop.f32.mrf.mxu2 }
 0x11f   :  { %v795_v44 = vmax.f32 %v489_v43, 0.0  ;;  %v658_v45 = vpop.f32.mrf.mxu3 }
 0x120   :  { %v796_v46 = vmax.f32 %v658_v45, 0.0  ;;  %v412_v47 = vpop.f32.mrf.mxu0 }
 0x121   :  { %v733_v48 = vmax.f32 %v412_v47, 0.0  ;;  %v581_v49 = vpop.f32.mrf.mxu1 }
 0x122   :  { %v876_v50 = vpack.c.bf16 %v796_v46, %v795_v44  ;;  %v734_v51 = vmax.f32 %v581_v49, 0.0 }
 0x124   :  { %940 = vst [vmem:[%s1618_s2 + $0x178] sm:$0xff] %v876_v50  ;;  %v845_v52 = vpack.c.bf16 %v734_v51, %v733_v48 }
 0x126   :  { %909 = vst [vmem:[%s1618_s2 + $0x80] sm:$0xff] %v845_v52  ;;  %v492_v53 = vpop.f32.mrf.mxu2 }
 0x127   :  { %v797_v54 = vmax.f32 %v492_v53, 0.0  ;;  %v661_v55 = vpop.f32.mrf.mxu3 }
 0x128   :  { %v798_v56 = vmax.f32 %v661_v55, 0.0  ;;  %v414_v57 = vpop.f32.mrf.mxu0 }
 0x129   :  { %v735_v58 = vmax.f32 %v414_v57, 0.0  ;;  %v583_v59 = vpop.f32.mrf.mxu1 }
 0x12a   :  { %v877_v60 = vpack.c.bf16 %v798_v56, %v797_v54  ;;  %v736_v61 = vmax.f32 %v583_v59, 0.0 }
 0x12c   :  { %941 = vst [vmem:[%s1618_s2 + $0x180] sm:$0xff] %v877_v60  ;;  %v846_v62 = vpack.c.bf16 %v736_v61, %v735_v58 }
 0x12e   :  { %910 = vst [vmem:[%s1618_s2 + $0x88] sm:$0xff] %v846_v62  ;;  %v494_v63 = vpop.f32.mrf.mxu2 }
 0x12f   :  { %v799_v0 = vmax.f32 %v494_v63, 0.0  ;;  %v663_v1 = vpop.f32.mrf.mxu3 }
 0x130   :  { %v800_v2 = vmax.f32 %v663_v1, 0.0  ;;  %v417_v3 = vpop.f32.mrf.mxu0 }
 0x131   :  { %v737_v4 = vmax.f32 %v417_v3, 0.0  ;;  %v586_v5 = vpop.f32.mrf.mxu1 }
 0x132   :  { %v878_v6 = vpack.c.bf16 %v800_v2, %v799_v0  ;;  %v738_v7 = vmax.f32 %v586_v5, 0.0 }
 0x134   :  { %942 = vst [vmem:[%s1618_s2 + $0x188] sm:$0xff] %v878_v6  ;;  %v847_v8 = vpack.c.bf16 %v738_v7, %v737_v4 }
 0x136   :  { %911 = vst [vmem:[%s1618_s2 + $0x90] sm:$0xff] %v847_v8  ;;  %v497_v9 = vpop.f32.mrf.mxu2 }
 0x137   :  { %v801_v10 = vmax.f32 %v497_v9, 0.0  ;;  %v666_v11 = vpop.f32.mrf.mxu3 }
 0x138   :  { %v802_v12 = vmax.f32 %v666_v11, 0.0  ;;  %v419_v13 = vpop.f32.mrf.mxu0 }
 0x139   :  { %v739_v14 = vmax.f32 %v419_v13, 0.0  ;;  %v588_v15 = vpop.f32.mrf.mxu1 }
 0x13a   :  { %v879_v16 = vpack.c.bf16 %v802_v12, %v801_v10  ;;  %v740_v17 = vmax.f32 %v588_v15, 0.0 }
 0x13c   :  { %943 = vst [vmem:[%s1618_s2 + $0x190] sm:$0xff] %v879_v16  ;;  %v848_v18 = vpack.c.bf16 %v740_v17, %v739_v14 }
 0x13e   :  { %912 = vst [vmem:[%s1618_s2 + $0x98] sm:$0xff] %v848_v18  ;;  %v499_v19 = vpop.f32.mrf.mxu2 }
 0x13f   :  { %v803_v20 = vmax.f32 %v499_v19, 0.0  ;;  %v668_v21 = vpop.f32.mrf.mxu3 }
 0x140   :  { %v804_v22 = vmax.f32 %v668_v21, 0.0  ;;  %v422_v23 = vpop.f32.mrf.mxu0 }
 0x141   :  { %v741_v24 = vmax.f32 %v422_v23, 0.0  ;;  %v591_v25 = vpop.f32.mrf.mxu1 }
 0x142   :  { %v880_v26 = vpack.c.bf16 %v804_v22, %v803_v20  ;;  %v742_v27 = vmax.f32 %v591_v25, 0.0 }
 0x144   :  { %944 = vst [vmem:[%s1618_s2 + $0x198] sm:$0xff] %v880_v26  ;;  %v849_v28 = vpack.c.bf16 %v742_v27, %v741_v24 }
 0x146   :  { %913 = vst [vmem:[%s1618_s2 + $0xa0] sm:$0xff] %v849_v28  ;;  %v502_v29 = vpop.f32.mrf.mxu2 }
 0x147   :  { %v805_v30 = vmax.f32 %v502_v29, 0.0  ;;  %v671_v31 = vpop.f32.mrf.mxu3 }
 0x148   :  { %v806_v32 = vmax.f32 %v671_v31, 0.0  ;;  %v424_v33 = vpop.f32.mrf.mxu0 }
 0x149   :  { %v743_v34 = vmax.f32 %v424_v33, 0.0  ;;  %v593_v35 = vpop.f32.mrf.mxu1 }
 0x14a   :  { %v881_v36 = vpack.c.bf16 %v806_v32, %v805_v30  ;;  %v744_v37 = vmax.f32 %v593_v35, 0.0 }
 0x14c   :  { %945 = vst [vmem:[%s1618_s2 + $0x1a0] sm:$0xff] %v881_v36  ;;  %v850_v38 = vpack.c.bf16 %v744_v37, %v743_v34 }
 0x14e   :  { %914 = vst [vmem:[%s1618_s2 + $0xa8] sm:$0xff] %v850_v38  ;;  %v504_v39 = vpop.f32.mrf.mxu2 }
 0x14f   :  { %v807_v40 = vmax.f32 %v504_v39, 0.0  ;;  %v673_v41 = vpop.f32.mrf.mxu3 }
 0x150   :  { %v808_v42 = vmax.f32 %v673_v41, 0.0  ;;  %v427_v43 = vpop.f32.mrf.mxu0 }
 0x151   :  { %v745_v44 = vmax.f32 %v427_v43, 0.0  ;;  %v596_v45 = vpop.f32.mrf.mxu1 }
 0x152   :  { %v882_v46 = vpack.c.bf16 %v808_v42, %v807_v40  ;;  %v746_v47 = vmax.f32 %v596_v45, 0.0 }
 0x154   :  { %946 = vst [vmem:[%s1618_s2 + $0x1a8] sm:$0xff] %v882_v46  ;;  %v851_v48 = vpack.c.bf16 %v746_v47, %v745_v44 }
 0x156   :  { %915 = vst [vmem:[%s1618_s2 + $0xb0] sm:$0xff] %v851_v48  ;;  %v507_v49 = vpop.f32.mrf.mxu2 }
 0x157   :  { %v809_v50 = vmax.f32 %v507_v49, 0.0  ;;  %v676_v51 = vpop.f32.mrf.mxu3 }
 0x158   :  { %v810_v52 = vmax.f32 %v676_v51, 0.0  ;;  %v429_v53 = vpop.f32.mrf.mxu0 }
 0x159   :  { %v747_v54 = vmax.f32 %v429_v53, 0.0  ;;  %v598_v55 = vpop.f32.mrf.mxu1 }
 0x15a   :  { %v883_v56 = vpack.c.bf16 %v810_v52, %v809_v50  ;;  %v748_v57 = vmax.f32 %v598_v55, 0.0 }
 0x15c   :  { %947 = vst [vmem:[%s1618_s2 + $0x1b0] sm:$0xff] %v883_v56  ;;  %v852_v58 = vpack.c.bf16 %v748_v57, %v747_v54 }
 0x15e   :  { %916 = vst [vmem:[%s1618_s2 + $0xb8] sm:$0xff] %v852_v58  ;;  %v509_v59 = vpop.f32.mrf.mxu2 }
 0x15f   :  { %v811_v60 = vmax.f32 %v509_v59, 0.0  ;;  %v678_v61 = vpop.f32.mrf.mxu3 }
 0x160   :  { %v812_v62 = vmax.f32 %v678_v61, 0.0  ;;  %v432_v63 = vpop.f32.mrf.mxu0 }
 0x161   :  { %v749_v0 = vmax.f32 %v432_v63, 0.0  ;;  %v601_v1 = vpop.f32.mrf.mxu1 }
 0x162   :  { %v884_v2 = vpack.c.bf16 %v812_v62, %v811_v60  ;;  %v750_v3 = vmax.f32 %v601_v1, 0.0 }
 0x164   :  { %948 = vst [vmem:[%s1618_s2 + $0x1b8] sm:$0xff] %v884_v2  ;;  %v853_v4 = vpack.c.bf16 %v750_v3, %v749_v0 }
 0x166   :  { %917 = vst [vmem:[%s1618_s2 + $0xc0] sm:$0xff] %v853_v4  ;;  %v512_v5 = vpop.f32.mrf.mxu2 }
 0x167   :  { %v813_v6 = vmax.f32 %v512_v5, 0.0  ;;  %v681_v7 = vpop.f32.mrf.mxu3 }
 0x168   :  { %v814_v8 = vmax.f32 %v681_v7, 0.0  ;;  %v434_v9 = vpop.f32.mrf.mxu0 }
 0x169   :  { %v751_v10 = vmax.f32 %v434_v9, 0.0  ;;  %v603_v11 = vpop.f32.mrf.mxu1 }
 0x16a   :  { %v885_v12 = vpack.c.bf16 %v814_v8, %v813_v6  ;;  %v752_v13 = vmax.f32 %v603_v11, 0.0 }
 0x16c   :  { %949 = vst [vmem:[%s1618_s2 + $0x1c0] sm:$0xff] %v885_v12  ;;  %v854_v14 = vpack.c.bf16 %v752_v13, %v751_v10 }
 0x16e   :  { %918 = vst [vmem:[%s1618_s2 + $0xc8] sm:$0xff] %v854_v14  ;;  %v514_v15 = vpop.f32.mrf.mxu2 }
 0x16f   :  { %v815_v16 = vmax.f32 %v514_v15, 0.0  ;;  %v683_v17 = vpop.f32.mrf.mxu3 }
 0x170   :  { %v816_v18 = vmax.f32 %v683_v17, 0.0  ;;  %v437_v19 = vpop.f32.mrf.mxu0 }
 0x171   :  { %v753_v20 = vmax.f32 %v437_v19, 0.0  ;;  %v606_v21 = vpop.f32.mrf.mxu1 }
 0x172   :  { %v886_v22 = vpack.c.bf16 %v816_v18, %v815_v16  ;;  %v754_v23 = vmax.f32 %v606_v21, 0.0 }
 0x174   :  { %950 = vst [vmem:[%s1618_s2 + $0x1c8] sm:$0xff] %v886_v22  ;;  %v855_v24 = vpack.c.bf16 %v754_v23, %v753_v20 }
 0x176   :  { %919 = vst [vmem:[%s1618_s2 + $0xd0] sm:$0xff] %v855_v24  ;;  %v517_v25 = vpop.f32.mrf.mxu2 }
 0x177   :  { %v817_v26 = vmax.f32 %v517_v25, 0.0  ;;  %v686_v27 = vpop.f32.mrf.mxu3 }
 0x178   :  { %v818_v28 = vmax.f32 %v686_v27, 0.0  ;;  %v439_v29 = vpop.f32.mrf.mxu0 }
 0x179   :  { %v755_v30 = vmax.f32 %v439_v29, 0.0  ;;  %v608_v31 = vpop.f32.mrf.mxu1 }
 0x17a   :  { %v887_v32 = vpack.c.bf16 %v818_v28, %v817_v26  ;;  %v756_v33 = vmax.f32 %v608_v31, 0.0 }
 0x17c   :  { %951 = vst [vmem:[%s1618_s2 + $0x1d0] sm:$0xff] %v887_v32  ;;  %v856_v34 = vpack.c.bf16 %v756_v33, %v755_v30 }
 0x17e   :  { %920 = vst [vmem:[%s1618_s2 + $0xd8] sm:$0xff] %v856_v34  ;;  %v519_v35 = vpop.f32.mrf.mxu2 }
 0x17f   :  { %v819_v36 = vmax.f32 %v519_v35, 0.0  ;;  %v688_v37 = vpop.f32.mrf.mxu3 }
 0x180   :  { %v820_v38 = vmax.f32 %v688_v37, 0.0  ;;  %v442_v39 = vpop.f32.mrf.mxu0 }
 0x181   :  { %v757_v40 = vmax.f32 %v442_v39, 0.0  ;;  %v611_v41 = vpop.f32.mrf.mxu1 }
 0x182   :  { %v888_v42 = vpack.c.bf16 %v820_v38, %v819_v36  ;;  %v758_v43 = vmax.f32 %v611_v41, 0.0 }
 0x184   :  { %952 = vst [vmem:[%s1618_s2 + $0x1d8] sm:$0xff] %v888_v42  ;;  %v857_v44 = vpack.c.bf16 %v758_v43, %v757_v40 }
 0x186   :  { %921 = vst [vmem:[%s1618_s2 + $0xe0] sm:$0xff] %v857_v44  ;;  %v522_v45 = vpop.f32.mrf.mxu2 }
 0x187   :  { %v821_v46 = vmax.f32 %v522_v45, 0.0  ;;  %v691_v47 = vpop.f32.mrf.mxu3 }
 0x188   :  { %v822_v48 = vmax.f32 %v691_v47, 0.0  ;;  %v444_v49 = vpop.f32.mrf.mxu0 }
 0x189   :  { %v759_v50 = vmax.f32 %v444_v49, 0.0  ;;  %v613_v51 = vpop.f32.mrf.mxu1 }
 0x18a   :  { %v889_v52 = vpack.c.bf16 %v822_v48, %v821_v46  ;;  %v760_v53 = vmax.f32 %v613_v51, 0.0 }
 0x18c   :  { %953 = vst [vmem:[%s1618_s2 + $0x1e0] sm:$0xff] %v889_v52  ;;  %v858_v54 = vpack.c.bf16 %v760_v53, %v759_v50 }
 0x18e   :  { %922 = vst [vmem:[%s1618_s2 + $0xe8] sm:$0xff] %v858_v54  ;;  %v524_v55 = vpop.f32.mrf.mxu2 }
 0x18f   :  { %v823_v56 = vmax.f32 %v524_v55, 0.0  ;;  %v693_v57 = vpop.f32.mrf.mxu3 }
 0x190   :  { %v824_v58 = vmax.f32 %v693_v57, 0.0  ;;  %v447_v59 = vpop.f32.mrf.mxu0 }
 0x191   :  { %v761_v60 = vmax.f32 %v447_v59, 0.0  ;;  %v616_v61 = vpop.f32.mrf.mxu1 }
 0x192   :  { %v890_v62 = vpack.c.bf16 %v824_v58, %v823_v56  ;;  %v762_v63 = vmax.f32 %v616_v61, 0.0 }
 0x194   :  { %954 = vst [vmem:[%s1618_s2 + $0x1e8] sm:$0xff] %v890_v62  ;;  %v859_v0 = vpack.c.bf16 %v762_v63, %v761_v60 }
 0x196   :  { %923 = vst [vmem:[%s1618_s2 + $0xf0] sm:$0xff] %v859_v0  ;;  %v527_v1 = vpop.f32.mrf.mxu2 }
 0x197   :  { %v825_v2 = vmax.f32 %v527_v1, 0.0  ;;  %v696_v3 = vpop.f32.mrf.mxu3 }
 0x198   :  { %v826_v4 = vmax.f32 %v696_v3, 0.0  ;;  %v449_v5 = vpop.f32.mrf.mxu0 }
 0x199   :  { %v763_v6 = vmax.f32 %v449_v5, 0.0  ;;  %v618_v7 = vpop.f32.mrf.mxu1 }
 0x19a   :  { %v891_v8 = vpack.c.bf16 %v826_v4, %v825_v2  ;;  %v764_v9 = vmax.f32 %v618_v7, 0.0 }
 0x19c   :  { %955 = vst [vmem:[%s1618_s2 + $0x1f0] sm:$0xff] %v891_v8  ;;  %v860_v10 = vpack.c.bf16 %v764_v9, %v763_v6 }
 0x19e   :  { %924 = vst [vmem:[%s1618_s2 + $0xf8] sm:$0xff] %v860_v10  ;;  %v529_v11 = vpop.f32.mrf.mxu2 }
 0x19f   :  { %v827_v12 = vmax.f32 %v529_v11, 0.0  ;;  %v698_v13 = vpop.f32.mrf.mxu3 }
 0x1a0   :  { %v828_v14 = vmax.f32 %v698_v13, 0.0 }
 0x1a2   :  { %v892_v15 = vpack.c.bf16 %v828_v14, %v827_v12 }
 0x1a4   :  { %956 = vst [vmem:[%s1618_s2 + $0x1f8] sm:$0xff] %v892_v15 }

</bundles_post_ra>
